<compile_context>
chip_gen: v7x
topology: tpu7x:2x2x1
jax: 0.10.0
libtpu: 0.0.40
codegen_flags: <defaults>
</compile_context>

<pallas_src>
import jax
import jax.numpy as jnp
from jax import lax
from jax.experimental import pallas as pl
from jax.experimental.pallas import tpu as pltpu

STATE_PAD = 8    # pad state_dim (4) + bias feature up to the f32 sublane multiple
CHUNK_B = 256    # in-kernel batch chunk (lanes) to bound vreg pressure


def policy_kernel(xT_ref, w1t_ref, wd_ref, bd_ref, p0_ref):
    # xT_ref : (STATE_PAD, tile_b) f32   -- batch on lanes; row S is the 1.0 bias feature
    # w1t_ref: (H, STATE_PAD)      bf16  -- grid-invariant; column S holds b1
    # wd_ref : (1, H)              bf16  -- w2[:,0] - w2[:,1]
    # bd_ref : (1, 1)              f32   -- b2[0]   - b2[1]
    # p0_ref : (1, tile_b)         f32   -- p(action 0), lane-dense
    n_chunks = xT_ref.shape[1] // CHUNK_B

    def body(c, carry):
        col = pl.multiple_of(c * CHUNK_B, CHUNK_B)
        xT = xT_ref[:, pl.ds(col, CHUNK_B)].astype(jnp.bfloat16)     # MXU operand

        # Layer 1: relu(W1^T x + b1); bias comes in via the 1.0 feature row.
        hT = jnp.dot(w1t_ref[...], xT, preferred_element_type=jnp.float32)
        hT = jnp.maximum(hT, 0.0)                                    # (H, CHUNK_B) f32

        # Layer 2 + softmax over 2 actions == sigmoid of the logit difference.
        d = jnp.dot(wd_ref[...], hT.astype(jnp.bfloat16),
                    preferred_element_type=jnp.float32)              # (1, CHUNK_B)
        d = d + bd_ref[...]

        # Numerically-stable sigmoid: exp + reciprocal both ride the EUP slot.
        t = jnp.exp(-jnp.abs(d))                                     # in (0, 1]
        inv = pl.reciprocal(1.0 + t, approx=True)                    # sigmoid(|d|)
        p0 = jnp.where(d >= 0.0, inv, 1.0 - inv)                     # sigmoid(d)

        p0_ref[:, pl.ds(col, CHUNK_B)] = p0.astype(p0_ref.dtype)
        return carry

    lax.fori_loop(0, n_chunks, body, 0, unroll=True)


def prepare_params(w1, b1, w2, b2):
    """One-time weight prep: pad, fold b1 into W1 (bias-feature row), transpose,
    bf16-cast, and fold the 2-way softmax head into a logit difference."""
    S, H = w1.shape
    A = w2.shape[1]
    assert A == 2, "sigmoid rewrite of the softmax head assumes action_dim == 2"
    assert S + 1 <= STATE_PAD
    w1_pad = jnp.zeros((STATE_PAD, H), jnp.float32)
    w1_pad = w1_pad.at[:S, :].set(w1)
    w1_pad = w1_pad.at[S, :].set(jnp.reshape(b1, (-1,)))             # fold b1
    w1t = w1_pad.T.astype(jnp.bfloat16)                              # (H, STATE_PAD)
    w_diff = jnp.reshape(w2[:, 0] - w2[:, 1], (1, H)).astype(jnp.bfloat16)
    b_flat = jnp.reshape(b2, (-1,))
    b_diff = jnp.reshape(b_flat[0] - b_flat[1], (1, 1)).astype(jnp.float32)
    return w1t, w_diff, b_diff


def policy_network_forward(x, w1t, w_diff, b_diff):
    """x: (B, state_dim) f32 -> probs: (B, 2) f32.  Wrap in jax.jit so the
    pad/transpose/slice/stack plumbing fuses with the kernel."""
    B, S = x.shape
    H, Sp = w1t.shape
    assert Sp == STATE_PAD and S + 1 <= STATE_PAD

    # 2 grid steps total (keeps both v7x TCs busy, near-free on 1-TC chips);
    # each tile is a multiple of the in-kernel 256-lane chunk.
    unit = 2 * CHUNK_B
    b_pad = max(unit, ((B + unit - 1) // unit) * unit)
    tile_b = b_pad // 2

    # Pad batch + features once; bias feature = 1.0; batch rides the lane axis.
    x_pad = jnp.zeros((b_pad, STATE_PAD), jnp.float32)
    x_pad = x_pad.at[:B, :S].set(x)
    x_pad = x_pad.at[:B, S].set(1.0)
    xT = x_pad.T                                                     # (STATE_PAD, b_pad)

    cost = pl.CostEstimate(
        flops=2 * b_pad * H * (STATE_PAD + 1),
        transcendentals=b_pad,
        bytes_accessed=(STATE_PAD * b_pad * 4        # xT in
                        + b_pad * 4                  # p0 out
                        + (H * STATE_PAD + H) * 2    # bf16 weights
                        + 4),                        # b_diff
    )

    p0_row = pl.pallas_call(
        policy_kernel,
        out_shape=jax.ShapeDtypeStruct((1, b_pad), jnp.float32),
        grid_spec=pltpu.PrefetchScalarGridSpec(
            num_scalar_prefetch=0,
            grid=(b_pad // tile_b,),                                 # == 2
            in_specs=[
                pl.BlockSpec((STATE_PAD, tile_b), lambda i: (0, i)),  # xT tile
                pl.BlockSpec((H, STATE_PAD), lambda i: (0, 0)),       # w1t (invariant)
                pl.BlockSpec((1, H), lambda i: (0, 0)),               # w_diff
                pl.BlockSpec((1, 1), lambda i: (0, 0)),               # b_diff
            ],
            out_specs=pl.BlockSpec((1, tile_b), lambda i: (0, i)),
        ),
        compiler_params=pltpu.CompilerParams(
            dimension_semantics=("parallel",)),                      # megacore on v7x
        cost_estimate=cost,
    )(xT, w1t, w_diff, b_diff)

    p0 = p0_row[0, :B]
    return jnp.stack([p0, 1.0 - p0], axis=-1)                        # (B, 2)


def init_params(key, state_dim, hidden_dim, action_dim):
    # Deterministic init mirroring nn.Linear defaults (uniform +/- 1/sqrt(fan_in)).
    k1, k2, k3, k4 = jax.random.split(key, 4)
    bound1 = 1.0 / jnp.sqrt(state_dim)
    bound2 = 1.0 / jnp.sqrt(hidden_dim)
    w1 = jax.random.uniform(k1, (state_dim, hidden_dim), jnp.float32, -bound1, bound1)
    b1 = jax.random.uniform(k2, (1, hidden_dim), jnp.float32, -bound1, bound1)
    w2 = jax.random.uniform(k3, (hidden_dim, action_dim), jnp.float32, -bound2, bound2)
    b2 = jax.random.uniform(k4, (1, action_dim), jnp.float32, -bound2, bound2)
    return w1, b1, w2, b2


if __name__ == "__main__":
    # CartPole-v1: state_dim=4, action_dim=2, hidden=128.  Batch of policy
    # evaluations amortizes the launch; the kernel runs as a 2-step grid.
    state_dim, hidden_dim, action_dim = 4, 128, 2
    batch = 1024

    key = jax.random.PRNGKey(0)
    kx, kp = jax.random.split(key)
    x = jax.random.normal(kx, (batch, state_dim), dtype=jnp.float32)
    w1, b1, w2, b2 = init_params(kp, state_dim, hidden_dim, action_dim)

    params = prepare_params(w1, b1, w2, b2)
    fwd = jax.jit(policy_network_forward)
    probs = fwd(x, *params)
    probs = jax.block_until_ready(probs)

    # Reference in full f32.
    ref = jax.nn.softmax(jnp.maximum(x @ w1 + b1, 0.0) @ w2 + b2, axis=-1)
    assert probs.shape == (batch, action_dim)
    assert jnp.allclose(jnp.sum(probs, axis=-1), 1.0, atol=1e-5)
    # bf16 MXU operands (incl. folded b1) + approx reciprocal -> loosened tolerance.
    assert jnp.allclose(probs, ref, atol=2e-2)

    print("KERNEL_OK")
</pallas_src>

<mosaic_0001>
module attributes {stable_mosaic.version = 11 : i64} {
  func.func @policy_kernel(%arg0: i32, %arg1: memref<8x512xf32, #tpu.memory_space<vmem>>, %arg2: memref<128x8xbf16, #tpu.memory_space<vmem>>, %arg3: memref<1x128xbf16, #tpu.memory_space<vmem>>, %arg4: memref<1x1xf32, #tpu.memory_space<vmem>>, %arg5: memref<1x512xf32, #tpu.memory_space<vmem>>) attributes {dimension_semantics = [#tpu.dimension_semantics<parallel>], iteration_bounds = array<i64: 2>, scalar_prefetch = 0 : i64, scratch_operands = 0 : i64, tpu.core_type = #tpu.core_type<tc>, window_params = [{transform_indices = @transform_0, window_bounds = array<i64: 8, 512>}, {pipeline_mode = #tpu.pipeline_mode<synchronous>, transform_indices = @transform_1, window_bounds = array<i64: 128, 8>}, {pipeline_mode = #tpu.pipeline_mode<synchronous>, transform_indices = @transform_2, window_bounds = array<i64: 1, 128>}, {pipeline_mode = #tpu.pipeline_mode<synchronous>, transform_indices = @transform_3, window_bounds = array<i64: 1, 1>}, {transform_indices = @transform_4, window_bounds = array<i64: 1, 512>}]} {
    %c0_i32 = arith.constant 0 : i32
    %c256_i32 = arith.constant 256 : i32
    %0 = arith.muli %c0_i32, %c256_i32 : i32
    %1 = tpu.assume_multiple %0, 256 : i32
    %c0 = arith.constant 0 : index
    %2 = arith.index_cast %1 : i32 to index
    %3 = vector.load %arg1[%c0, %2] : memref<8x512xf32, #tpu.memory_space<vmem>>, vector<8x256xf32>
    %4 = arith.truncf %3 : vector<8x256xf32> to vector<8x256xbf16>
    %c0_0 = arith.constant 0 : index
    %c0_1 = arith.constant 0 : index
    %5 = vector.load %arg2[%c0_0, %c0_1] : memref<128x8xbf16, #tpu.memory_space<vmem>>, vector<128x8xbf16>
    %cst = arith.constant dense<0.000000e+00> : vector<128x256xf32>
    %6 = tpu.matmul %5, %4, %cst {dimension_numbers = #tpu.dot_dimension_numbers<[1], [0], [0], [1], [0, 0, 1, 1], [], []>} : vector<128x8xbf16>, vector<8x256xbf16>, vector<128x256xf32> -> vector<128x256xf32>
    %cst_2 = arith.constant 0.000000e+00 : f32
    %7 = vector.broadcast %cst_2 : f32 to vector<128x256xf32>
    %8 = arith.maximumf %6, %7 : vector<128x256xf32>
    %c0_3 = arith.constant 0 : index
    %c0_4 = arith.constant 0 : index
    %9 = vector.load %arg3[%c0_3, %c0_4] : memref<1x128xbf16, #tpu.memory_space<vmem>>, vector<1x128xbf16>
    %10 = arith.truncf %8 : vector<128x256xf32> to vector<128x256xbf16>
    %cst_5 = arith.constant dense<0.000000e+00> : vector<1x256xf32>
    %11 = tpu.matmul %9, %10, %cst_5 {dimension_numbers = #tpu.dot_dimension_numbers<[1], [0], [0], [1], [0, 0, 1, 1], [], []>} : vector<1x128xbf16>, vector<128x256xbf16>, vector<1x256xf32> -> vector<1x256xf32>
    %c0_6 = arith.constant 0 : index
    %c0_7 = arith.constant 0 : index
    %12 = vector.load %arg4[%c0_6, %c0_7] : memref<1x1xf32, #tpu.memory_space<vmem>>, vector<1x1xf32>
    %13 = vector.broadcast %12 : vector<1x1xf32> to vector<1x256xf32>
    %14 = arith.addf %11, %13 : vector<1x256xf32>
    %15 = math.absf %14 : vector<1x256xf32>
    %cst_8 = arith.constant 0.000000e+00 : f32
    %16 = vector.broadcast %cst_8 : f32 to vector<1x256xf32>
    %17 = arith.subf %16, %15 : vector<1x256xf32>
    %18 = math.exp %17 : vector<1x256xf32>
    %cst_9 = arith.constant 1.000000e+00 : f32
    %19 = vector.broadcast %cst_9 : f32 to vector<1x256xf32>
    %20 = arith.addf %19, %18 : vector<1x256xf32>
    %21 = tpu.reciprocal %20 {approx = true} : vector<1x256xf32> -> vector<1x256xf32>
    %cst_10 = arith.constant 0.000000e+00 : f32
    %22 = vector.broadcast %cst_10 : f32 to vector<1x256xf32>
    %23 = arith.cmpf oge, %14, %22 : vector<1x256xf32>
    %cst_11 = arith.constant 1.000000e+00 : f32
    %24 = vector.broadcast %cst_11 : f32 to vector<1x256xf32>
    %25 = arith.subf %24, %21 : vector<1x256xf32>
    %26 = arith.select %23, %21, %25 : vector<1x256xi1>, vector<1x256xf32>
    %c0_12 = arith.constant 0 : index
    %27 = arith.index_cast %1 : i32 to index
    %28 = vector.load %arg5[%c0_12, %27] : memref<1x512xf32, #tpu.memory_space<vmem>>, vector<1x256xf32>
    tpu.vector_store %arg5[%c0_12, %27], %26 {strides = array<i32>} : memref<1x512xf32, #tpu.memory_space<vmem>>, vector<1x256xf32>,
    %c1_i32 = arith.constant 1 : i32
    %c256_i32_13 = arith.constant 256 : i32
    %29 = arith.muli %c1_i32, %c256_i32_13 : i32
    %30 = tpu.assume_multiple %29, 256 : i32
    %c0_14 = arith.constant 0 : index
    %31 = arith.index_cast %30 : i32 to index
    %32 = vector.load %arg1[%c0_14, %31] : memref<8x512xf32, #tpu.memory_space<vmem>>, vector<8x256xf32>
    %33 = arith.truncf %32 : vector<8x256xf32> to vector<8x256xbf16>
    %c0_15 = arith.constant 0 : index
    %c0_16 = arith.constant 0 : index
    %34 = vector.load %arg2[%c0_15, %c0_16] : memref<128x8xbf16, #tpu.memory_space<vmem>>, vector<128x8xbf16>
    %cst_17 = arith.constant dense<0.000000e+00> : vector<128x256xf32>
    %35 = tpu.matmul %34, %33, %cst_17 {dimension_numbers = #tpu.dot_dimension_numbers<[1], [0], [0], [1], [0, 0, 1, 1], [], []>} : vector<128x8xbf16>, vector<8x256xbf16>, vector<128x256xf32> -> vector<128x256xf32>
    %cst_18 = arith.constant 0.000000e+00 : f32
    %36 = vector.broadcast %cst_18 : f32 to vector<128x256xf32>
    %37 = arith.maximumf %35, %36 : vector<128x256xf32>
    %c0_19 = arith.constant 0 : index
    %c0_20 = arith.constant 0 : index
    %38 = vector.load %arg3[%c0_19, %c0_20] : memref<1x128xbf16, #tpu.memory_space<vmem>>, vector<1x128xbf16>
    %39 = arith.truncf %37 : vector<128x256xf32> to vector<128x256xbf16>
    %cst_21 = arith.constant dense<0.000000e+00> : vector<1x256xf32>
    %40 = tpu.matmul %38, %39, %cst_21 {dimension_numbers = #tpu.dot_dimension_numbers<[1], [0], [0], [1], [0, 0, 1, 1], [], []>} : vector<1x128xbf16>, vector<128x256xbf16>, vector<1x256xf32> -> vector<1x256xf32>
    %c0_22 = arith.constant 0 : index
    %c0_23 = arith.constant 0 : index
    %41 = vector.load %arg4[%c0_22, %c0_23] : memref<1x1xf32, #tpu.memory_space<vmem>>, vector<1x1xf32>
    %42 = vector.broadcast %41 : vector<1x1xf32> to vector<1x256xf32>
    %43 = arith.addf %40, %42 : vector<1x256xf32>
    %44 = math.absf %43 : vector<1x256xf32>
    %cst_24 = arith.constant 0.000000e+00 : f32
    %45 = vector.broadcast %cst_24 : f32 to vector<1x256xf32>
    %46 = arith.subf %45, %44 : vector<1x256xf32>
    %47 = math.exp %46 : vector<1x256xf32>
    %cst_25 = arith.constant 1.000000e+00 : f32
    %48 = vector.broadcast %cst_25 : f32 to vector<1x256xf32>
    %49 = arith.addf %48, %47 : vector<1x256xf32>
    %50 = tpu.reciprocal %49 {approx = true} : vector<1x256xf32> -> vector<1x256xf32>
    %cst_26 = arith.constant 0.000000e+00 : f32
    %51 = vector.broadcast %cst_26 : f32 to vector<1x256xf32>
    %52 = arith.cmpf oge, %43, %51 : vector<1x256xf32>
    %cst_27 = arith.constant 1.000000e+00 : f32
    %53 = vector.broadcast %cst_27 : f32 to vector<1x256xf32>
    %54 = arith.subf %53, %50 : vector<1x256xf32>
    %55 = arith.select %52, %50, %54 : vector<1x256xi1>, vector<1x256xf32>
    %c0_28 = arith.constant 0 : index
    %56 = arith.index_cast %30 : i32 to index
    %57 = vector.load %arg5[%c0_28, %56] : memref<1x512xf32, #tpu.memory_space<vmem>>, vector<1x256xf32>
    tpu.vector_store %arg5[%c0_28, %56], %55 {strides = array<i32>} : memref<1x512xf32, #tpu.memory_space<vmem>>, vector<1x256xf32>,
    %c2_i32 = arith.constant 2 : i32
    return
  }
  func.func @transform_0(%arg0: i32) -> (i32, i32) {
    %c0_i32 = arith.constant 0 : i32
    %c0_i32_0 = arith.constant 0 : i32
    return %c0_i32, %arg0 : i32, i32
  }
  func.func @transform_1(%arg0: i32) -> (i32, i32) {
    %c0_i32 = arith.constant 0 : i32
    %c0_i32_0 = arith.constant 0 : i32
    %c0_i32_1 = arith.constant 0 : i32
    return %c0_i32, %c0_i32_0 : i32, i32
  }
  func.func @transform_2(%arg0: i32) -> (i32, i32) {
    %c0_i32 = arith.constant 0 : i32
    %c0_i32_0 = arith.constant 0 : i32
    %c0_i32_1 = arith.constant 0 : i32
    return %c0_i32, %c0_i32_0 : i32, i32
  }
  func.func @transform_3(%arg0: i32) -> (i32, i32) {
    %c0_i32 = arith.constant 0 : i32
    %c0_i32_0 = arith.constant 0 : i32
    %c0_i32_1 = arith.constant 0 : i32
    return %c0_i32, %c0_i32_0 : i32, i32
  }
  func.func @transform_4(%arg0: i32) -> (i32, i32) {
    %c0_i32 = arith.constant 0 : i32
    %c0_i32_0 = arith.constant 0 : i32
    return %c0_i32, %arg0 : i32, i32
  }
}

</mosaic_0001>

<bundles_post_ra>
// kernel: policy_network_forward.1
= control target key start
LH: loop header
LB: loop body
LE: loop exit
PB: predicated region body
PF: predicated region fallthrough
CT: control target
= control target key end

     0   :  { %s1068_s17 = smov 0   ;;  %s1224_s0 = inlined_call_operand.vmem [shape: f32[8,1024], index: 0, kind: input, shape index: {}]   ;;  %s1225_s1 = inlined_call_operand.vmem [shape: bf16[128,8], index: 1, kind: input, shape index: {}]   ;;  %s1226_s2 = inlined_call_operand.vmem [shape: bf16[1,128], index: 2, kind: input, shape index: {}]   ;;  %s1227_s3 = inlined_call_operand.<no memory space> [shape: f32[1,1], index: 3, kind: input, shape index: {}]   ;;  %s1228_s4 = inlined_call_operand.vmem [shape: f32[1,1024], index: 4, kind: output, shape index: {}]  }
   0x1   :  { %v9_v0 = vstv %s1227_s3 }
   0x2   :  { %10 = vst [vmem:[#allocation2] sm:$0x1] %v9_v0 }
   0x3 LB: > { %s940_s18 = sadd.s32 4294967295, %s1036_s17   ;;  %p944_p0 = scmp.ge.s32.totalorder %s1036_s17, 1  ;;  %s1036_s17 = sphi %s1068_s17, %s16_s17  }
   0x4   : > { %p165_p1 = scmp.lt.s32.totalorder %s1036_s17, 3 }
   0x6   : > { %p166_p2 = pnand %p944_p0, %p165_p1 }
   0x7   : > { %s945_s19 = sshll.u32 (!%p166_p2), %s940_s18, 2  ;;  %v1038_v1 = vmov (!%p166_p2), 0   ;;  %vm287_vm0 = vcmask (!%p166_p2), 1043456   ;;  %v998_v6 = vld [vmem:[%s1225_s1] sm:$0xff] (!%p166_p2)   ;;  %vm262_vm1 = vcmask (!%p166_p2), 64512   ;;  %v999_v8 = vld [vmem:[%s1225_s1 + $0x8] sm:$0xff] (!%p166_p2)  }
   0x8   : > { %169 = sbr.rel (%p166_p2) target bundleno = 846 (0x34e), region = 36  ;;  %p191_p3 = scmp.lt.s32.totalorder (!%p166_p2), %s945_s19, 7  ;;  %326 = vmatprep.mubr.bf16.mxu0 (!%p166_p2), %v1038_v1  ;;  %498 = vmatprep.mubr.bf16.mxu1 (!%p166_p2), %v1038_v1  ;;  %v1000_v9 = vld [vmem:[%s1225_s1 + $0x10] sm:$0xff] (!%p166_p2)   ;;  %v1001_v10 = vld [vmem:[%s1225_s1 + $0x18] sm:$0xff] (!%p166_p2)   ;;  %v1002_v11 = vld [vmem:[%s1225_s1 + $0x20] sm:$0xff] (!%p166_p2)  }
   0x9   : > { %997 = vset.pattern.permute.xlu0 (!%p166_p2), %v1038_v1  ;;  %v1003_v12 = vld [vmem:[%s1225_s1 + $0x28] sm:$0xff] (!%p166_p2)   ;;  %v1004_v13 = vld [vmem:[%s1225_s1 + $0x30] sm:$0xff] (!%p166_p2)   ;;  %v1005_v14 = vld [vmem:[%s1225_s1 + $0x38] sm:$0xff] (!%p166_p2)  }
   0xa   : > { %v456_v23 = vld [vmem:[#allocation2] sm:$0x1] (!%p166_p2) }
   0xb   : > { %459 = vperm.xlu0 (!%p166_p2), %997, %v456_v23  }
   0xf   : > { %s1232_s19 = smov (!%p191_p3, %s945_s19), 7 }
  0x10   : > { %s946_s3 = sshll.u32 %s1232_s19, 3  ;;  %s1200_s8 = scalar_lea.vmem %s1228_s4, %s1232_s19 }
  0x11   : > { %s1085_s22 = scalar_lea.vmem %s1224_s0, %s946_s3 }
  0x12   : > { %v203_v2 = vld [vmem:[%s1085_s22 + $0x8] sm:$0xff]  ;;  %v202_v3 = vld [vmem:[%s1085_s22] sm:$0xff] }
  0x13   : > { %v205_v4 = vpack.c.bf16 %v203_v2, %v203_v2  ;;  %v204_v5 = vpack.c.bf16 %v202_v3, %v202_v3 }
  0x15   : > { %956 = vmatprep.subr.msk.bf16.mxu0 %vm287_vm0, %v205_v4  ;;  %v289_v7 = vsel %vm287_vm0, %v204_v5, 0 }
  0x16   : > { %295 = vmatpush1.bf16.msra.mxu0 %v289_v7 }
  0x19   : > { %957 = vmatmul.mubr.msk.bf16.vlgmr.msra.gmra.mrb[0].mxu0 %vm262_vm1, %v998_v6 }
  0x1a   : > { %336 = vmatprep.mubr.bf16.mxu0 %v1038_v1 }
  0x21   : > { %958 = vmatmul.mubr.msk.bf16.gmra.mrb[4].mxu0 %vm262_vm1, %v999_v8 }
  0x22   : > { %346 = vmatprep.mubr.bf16.mxu0 %v1038_v1 }
  0x29   : > { %959 = vmatmul.mubr.msk.bf16.gmra.mrb[8].mxu0 %vm262_vm1, %v1000_v9 }
  0x2a   : > { %356 = vmatprep.mubr.bf16.mxu0 %v1038_v1 }
  0x31   : > { %960 = vmatmul.mubr.msk.bf16.gmra.mrb[12].mxu0 %vm262_vm1, %v1001_v10 }
  0x32   : > { %366 = vmatprep.mubr.bf16.mxu0 %v1038_v1 }
  0x39   : > { %961 = vmatmul.mubr.msk.bf16.gmra.mrb[16].mxu0 %vm262_vm1, %v1002_v11 }
  0x3a   : > { %376 = vmatprep.mubr.bf16.mxu0 %v1038_v1 }
  0x41   : > { %962 = vmatmul.mubr.msk.bf16.gmra.mrb[20].mxu0 %vm262_vm1, %v1003_v12 }
  0x42   : > { %386 = vmatprep.mubr.bf16.mxu0 %v1038_v1 }
  0x49   : > { %963 = vmatmul.mubr.msk.bf16.gmra.mrb[24].mxu0 %vm262_vm1, %v1004_v13 }
  0x4a   : > { %396 = vmatprep.mubr.bf16.mxu0 %v1038_v1 }
  0x51   : > { %964 = vmatmul.mubr.msk.bf16.gmra.mrb[28].mxu0 %vm262_vm1, %v1005_v14 }
  0x52   : > { %843 = vmatprep.mubr.bf16.mxu0 %v1038_v1 }
  0xec   : > { %v328_v15 = vpop.f32.mrb[0].mxu0 }
  0xed   : > { %v330_v16 = vpop.f32.mrb[1].mxu0  ;;  %v407_v18 = vmax.f32 %v328_v15, 0.0 }
  0xee   : > { %v332_v17 = vpop.f32.mrb[2].mxu0  ;;  %v408_v21 = vmax.f32 %v330_v16, 0.0 }
  0xef   : > { %v409_v19 = vmax.f32 %v332_v17, 0.0  ;;  %v334_v20 = vpop.f32.mrb[3].mxu0 }
  0xf0   : > { %v410_v22 = vmax.f32 %v334_v20, 0.0 }
  0xf1   : > { %v440_v24 = vpack.c.bf16 %v409_v19, %v407_v18 }
  0xf2   : > { %v441_v25 = vpack.c.bf16 %v410_v22, %v408_v21 }
  0xf4   : > { %v338_v26 = vpop.f32.mrb[4].mxu0  ;;  %466 = vmatprep.subr.bf16.mxu1 %v441_v25 }
  0xf5   : > { %v340_v27 = vpop.f32.mrb[5].mxu0  ;;  %467 = vmatpush1.bf16.msra.mxu1 %v440_v24  ;;  %v411_v29 = vmax.f32 %v338_v26, 0.0 }
  0xf6   : > { %v342_v28 = vpop.f32.mrb[6].mxu0  ;;  %v412_v32 = vmax.f32 %v340_v27, 0.0 }
  0xf7   : > { %v413_v30 = vmax.f32 %v342_v28, 0.0  ;;  %v344_v31 = vpop.f32.mrb[7].mxu0 }
  0xf8   : > { %v414_v33 = vmax.f32 %v344_v31, 0.0 }
  0xf9   : > { %v442_v34 = vpack.c.bf16 %v413_v30, %v411_v29  ;;  %v966_v29 = vld [vmem:[%s1085_s22 + $0x18] sm:$0xff]  ;;  %v965_v30 = vld [vmem:[%s1085_s22 + $0x10] sm:$0xff] }
  0xfa   : > { %v443_v35 = vpack.c.bf16 %v414_v33, %v412_v32 }
  0xfc   : > { %v348_v36 = vpop.f32.mrb[8].mxu0  ;;  %468 = vmatprep.subr.bf16.mxu1 %v443_v35  ;;  %v552_v35 = vpack.c.bf16 %v966_v29, %v966_v29 }
  0xfd   : > { %v350_v37 = vpop.f32.mrb[9].mxu0  ;;  %469 = vmatpush1.bf16.msra.mxu1 %v442_v34  ;;  %v415_v39 = vmax.f32 %v348_v36, 0.0  ;;  %v551_v36 = vpack.c.bf16 %v965_v30, %v965_v30 }
  0xfe   : > { %v352_v38 = vpop.f32.mrb[10].mxu0  ;;  %v416_v42 = vmax.f32 %v350_v37, 0.0  ;;  %v439_v37 = vld [vmem:[%s1226_s2] sm:$0x1] }
  0xff   : > { %v417_v40 = vmax.f32 %v352_v38, 0.0  ;;  %v354_v41 = vpop.f32.mrb[11].mxu0  ;;  %v634_v38 = vsel %vm287_vm0, %v551_v36, 0 }
 0x100   : > { %v418_v43 = vmax.f32 %v354_v41, 0.0  ;;  %v1008_v41 = vld [vmem:[%s1225_s1 + $0x10] sm:$0xff]  }
 0x101   : > { %v444_v44 = vpack.c.bf16 %v417_v40, %v415_v39  ;;  %v1006_v39 = vld [vmem:[%s1225_s1] sm:$0xff]   ;;  %v1007_v40 = vld [vmem:[%s1225_s1 + $0x8] sm:$0xff]  }
 0x102   : > { %v445_v45 = vpack.c.bf16 %v418_v43, %v416_v42  ;;  %v1009_v42 = vld [vmem:[%s1225_s1 + $0x18] sm:$0xff]   ;;  %v1010_v43 = vld [vmem:[%s1225_s1 + $0x20] sm:$0xff]  }
 0x104   : > { %v358_v46 = vpop.f32.mrb[12].mxu0  ;;  %470 = vmatprep.subr.bf16.mxu1 %v445_v45  ;;  %v1012_v45 = vld [vmem:[%s1225_s1 + $0x30] sm:$0xff]  }
 0x105   : > { %v360_v47 = vpop.f32.mrb[13].mxu0  ;;  %471 = vmatpush1.bf16.msra.mxu1 %v444_v44  ;;  %v419_v49 = vmax.f32 %v358_v46, 0.0  ;;  %v1011_v44 = vld [vmem:[%s1225_s1 + $0x28] sm:$0xff]   ;;  %v1013_v46 = vld [vmem:[%s1225_s1 + $0x38] sm:$0xff]  }
 0x106   : > { %v362_v48 = vpop.f32.mrb[14].mxu0  ;;  %v420_v52 = vmax.f32 %v360_v47, 0.0  ;;  %v801_v47 = vld [vmem:[#allocation2] sm:$0x1] }
 0x107   : > { %v421_v50 = vmax.f32 %v362_v48, 0.0  ;;  %v364_v51 = vpop.f32.mrb[15].mxu0  ;;  %804 = vperm.xlu0 %997, %v801_v47   ;;  %v462_v48 = vlaneseq }
 0x108   : > { %v422_v53 = vmax.f32 %v364_v51, 0.0  ;;  %v460_v51 = vpop.permute.xlu0 %459 }
 0x109   : > { %v446_v54 = vpack.c.bf16 %v421_v50, %v419_v49  ;;  %v1179_v49 = vshrl.u32 %v462_v48, 7  ;;  %vm1203_vm4 = vcmp.lt.s32.totalorder %v462_v48, 256 }
 0x10a   : > { %v447_v55 = vpack.c.bf16 %v422_v53, %v420_v52 }
 0x10b   : > { %v464_v50 = vsub.s32 0, %v1179_v49 }
 0x10c   : > { %v368_v56 = vpop.f32.mrb[16].mxu0  ;;  %472 = vmatprep.subr.bf16.mxu1 %v447_v55 }
 0x10d   : > { %v370_v57 = vpop.f32.mrb[17].mxu0  ;;  %473 = vmatpush1.bf16.msra.mxu1 %v446_v54  ;;  %v423_v59 = vmax.f32 %v368_v56, 0.0  ;;  %v465_v52 = vrot.slane %v460_v51, %v464_v50 }
 0x10e   : > { %v372_v58 = vpop.f32.mrb[18].mxu0  ;;  %v424_v62 = vmax.f32 %v370_v57, 0.0 }
 0x10f   : > { %v425_v60 = vmax.f32 %v372_v58, 0.0  ;;  %v374_v61 = vpop.f32.mrb[19].mxu0 }
 0x110   : > { %v426_v63 = vmax.f32 %v374_v61, 0.0 }
 0x111   : > { %v448_v0 = vpack.c.bf16 %v425_v60, %v423_v59 }
 0x112   : > { %v449_v2 = vpack.c.bf16 %v426_v63, %v424_v62 }
 0x114   : > { %v378_v3 = vpop.f32.mrb[20].mxu0  ;;  %474 = vmatprep.subr.bf16.mxu1 %v449_v2 }
 0x115   : > { %v380_v4 = vpop.f32.mrb[21].mxu0  ;;  %475 = vmatpush1.bf16.msra.mxu1 %v448_v0  ;;  %v427_v6 = vmax.f32 %v378_v3, 0.0 }
 0x116   : > { %v382_v5 = vpop.f32.mrb[22].mxu0  ;;  %v428_v9 = vmax.f32 %v380_v4, 0.0 }
 0x117   : > { %v429_v7 = vmax.f32 %v382_v5, 0.0  ;;  %v384_v8 = vpop.f32.mrb[23].mxu0 }
 0x118   : > { %v430_v10 = vmax.f32 %v384_v8, 0.0 }
 0x119   : > { %v450_v11 = vpack.c.bf16 %v429_v7, %v427_v6 }
 0x11a   : > { %v451_v12 = vpack.c.bf16 %v430_v10, %v428_v9 }
 0x11c   : > { %v388_v13 = vpop.f32.mrb[24].mxu0  ;;  %476 = vmatprep.subr.bf16.mxu1 %v451_v12 }
 0x11d   : > { %v390_v14 = vpop.f32.mrb[25].mxu0  ;;  %477 = vmatpush1.bf16.msra.mxu1 %v450_v11  ;;  %v431_v16 = vmax.f32 %v388_v13, 0.0 }
 0x11e   : > { %v392_v15 = vpop.f32.mrb[26].mxu0  ;;  %v432_v19 = vmax.f32 %v390_v14, 0.0 }
 0x11f   : > { %v433_v17 = vmax.f32 %v392_v15, 0.0  ;;  %v394_v18 = vpop.f32.mrb[27].mxu0 }
 0x120   : > { %v434_v20 = vmax.f32 %v394_v18, 0.0 }
 0x121   : > { %v452_v21 = vpack.c.bf16 %v433_v17, %v431_v16 }
 0x122   : > { %v453_v22 = vpack.c.bf16 %v434_v20, %v432_v19 }
 0x124   : > { %v398_v23 = vpop.f32.mrb[28].mxu0  ;;  %478 = vmatprep.subr.bf16.mxu1 %v453_v22 }
 0x125   : > { %v400_v24 = vpop.f32.mrb[29].mxu0  ;;  %479 = vmatpush1.bf16.msra.mxu1 %v452_v21  ;;  %v435_v26 = vmax.f32 %v398_v23, 0.0 }
 0x126   : > { %v402_v25 = vpop.f32.mrb[30].mxu0  ;;  %v436_v31 = vmax.f32 %v400_v24, 0.0 }
 0x127   : > { %v437_v27 = vmax.f32 %v402_v25, 0.0  ;;  %v404_v28 = vpop.f32.mrb[31].mxu0 }
 0x128   : > { %v438_v32 = vmax.f32 %v404_v28, 0.0 }
 0x129   : > { %v454_v33 = vpack.c.bf16 %v437_v27, %v435_v26  ;;  %v1039_v27 = vmov 1966171168  }
 0x12a   : > { %v455_v34 = vpack.c.bf16 %v438_v32, %v436_v31  ;;  %v529_v28 = vunpack.c.l.s4 %v1039_v27 }
 0x12c   : > { %480 = vmatprep.subr.bf16.mxu1 %v455_v34  ;;  %v530_v36 = vunpack.c.0.s8 %v529_v28 }
 0x12d   : > { %481 = vmatpush1.bf16.msra.mxu1 %v454_v33 }
 0x12e   : > { %975 = vmatprep.subr.msk.bf16.mxu1 %vm287_vm0, %v552_v35 }
 0x130   : > { %499 = vmatmul.mubr.bf16.vlgmr.msra.gmra.mrb[0].mxu1 %v439_v37 }
 0x131   : > { %640 = vmatpush1.bf16.msra.mxu1 %v634_v38  ;;  %671 = vmatprep.mubr.bf16.mxu1 %v1038_v1 }
 0x138   : > { %976 = vmatmul.mubr.msk.bf16.vlgmr.msra.gmra.mrb[4].mxu1 %vm262_vm1, %v1006_v39 }
 0x139   : > { %681 = vmatprep.mubr.bf16.mxu1 %v1038_v1 }
 0x140   : > { %977 = vmatmul.mubr.msk.bf16.gmra.mrb[8].mxu1 %vm262_vm1, %v1007_v40 }
 0x141   : > { %691 = vmatprep.mubr.bf16.mxu1 %v1038_v1 }
 0x148   : > { %978 = vmatmul.mubr.msk.bf16.gmra.mrb[12].mxu1 %vm262_vm1, %v1008_v41 }
 0x149   : > { %701 = vmatprep.mubr.bf16.mxu1 %v1038_v1 }
 0x150   : > { %979 = vmatmul.mubr.msk.bf16.gmra.mrb[16].mxu1 %vm262_vm1, %v1009_v42 }
 0x151   : > { %711 = vmatprep.mubr.bf16.mxu1 %v1038_v1 }
 0x158   : > { %980 = vmatmul.mubr.msk.bf16.gmra.mrb[20].mxu1 %vm262_vm1, %v1010_v43  ;;  %v1191_v43 = vsub.s32 %v530_v36, %v1179_v49 }
 0x159   : > { %721 = vmatprep.mubr.bf16.mxu1 %v1038_v1 }
 0x160   : > { %981 = vmatmul.mubr.msk.bf16.gmra.mrb[24].mxu1 %vm262_vm1, %v1011_v44 }
 0x161   : > { %731 = vmatprep.mubr.bf16.mxu1 %v1038_v1 }
 0x168   : > { %982 = vmatmul.mubr.msk.bf16.gmra.mrb[28].mxu1 %vm262_vm1, %v1012_v45 }
 0x169   : > { %741 = vmatprep.mubr.bf16.mxu1 %v1038_v1 }
 0x170   : > { %983 = vmatmul.mubr.msk.bf16.gmra.mrb[32].mxu1 %vm262_vm1, %v1013_v46 }
 0x203   : > { %v500_v53 = vpop.f32.mrb[0].mxu1 }
 0x204   : > { %v1184_v1 = vadd.f32 %v500_v53, %v465_v52  ;;  %v502_v54 = vpop.f32.mrb[1].mxu1 }
 0x205   : > { %v1186_v55 = vadd.f32 %v502_v54, %v465_v52  ;;  %v504_v56 = vpop.f32.mrb[2].mxu1 }
 0x206   : > { %v507_v57 = vand.u32 2147483647, %v1184_v1  ;;  %v505_v58 = vpop.f32.mrb[3].mxu1  ;;  %vm519_vm2 = vcmp.ge.f32.partialorder %v1184_v1, 0.0 }
 0x207   : > { %v508_v59 = vand.u32 2147483647, %v1186_v55  ;;  %vm520_vm3 = vcmp.ge.f32.partialorder %v1186_v55, 0.0 }
 0x208   : > { %v509_v60 = vsub.f32 0.0, %v507_v57 }
 0x209   : > { %v510_v61 = vsub.f32 0.0, %v508_v59 }
 0x20a   : > { %v511_v62 = vmul.f32 1.442695, %v509_v60 }
 0x20b   : > { %v513_v63 = vmul.f32 1.442695, %v510_v61  ;;  %v673_v0 = vpop.f32.mrb[4].mxu1 }
 0x20c   : > { %1014 = vpow2.f32 %v511_v62  ;;  %v675_v2 = vpop.f32.mrb[5].mxu1  ;;  %v752_v4 = vmax.f32 %v673_v0, 0.0 }
 0x20d   : > { %1016 = vpow2.f32 %v513_v63  ;;  %v677_v3 = vpop.f32.mrb[6].mxu1  ;;  %v753_v7 = vmax.f32 %v675_v2, 0.0 }
 0x20e   : > { %v754_v5 = vmax.f32 %v677_v3, 0.0  ;;  %v679_v6 = vpop.f32.mrb[7].mxu1 }
 0x20f   : > { %v755_v8 = vmax.f32 %v679_v6, 0.0 }
 0x210   : > { %v785_v9 = vpack.c.bf16 %v754_v5, %v752_v4 }
 0x211   : > { %v786_v10 = vpack.c.bf16 %v755_v8, %v753_v7 }
 0x213   : > { %v683_v11 = vpop.f32.mrb[8].mxu1  ;;  %811 = vmatprep.subr.bf16.mxu0 %v786_v10 }
 0x214   : > { %v685_v12 = vpop.f32.mrb[9].mxu1  ;;  %812 = vmatpush1.bf16.msra.mxu0 %v785_v9  ;;  %v756_v15 = vmax.f32 %v683_v11, 0.0 }
 0x215   : > { %v687_v13 = vpop.f32.mrb[10].mxu1  ;;  %v757_v20 = vmax.f32 %v685_v12, 0.0 }
 0x216   : > { %v1015_v14 = vpop.eup %1014  ;;  %v758_v16 = vmax.f32 %v687_v13, 0.0  ;;  %v689_v17 = vpop.f32.mrb[11].mxu1 }
 0x217   : > { %v1017_v18 = vpop.eup %1016  ;;  %v515_v19 = vadd.f32 1.0, %v1015_v14  ;;  %v759_v21 = vmax.f32 %v689_v17, 0.0 }
 0x218   : > { %v516_v22 = vadd.f32 1.0, %v1017_v18  ;;  %v787_v23 = vpack.c.bf16 %v758_v16, %v756_v15 }
 0x219   : > { %1018 = vrcp.f32 %v515_v19  ;;  %v788_v24 = vpack.c.bf16 %v759_v21, %v757_v20 }
 0x21a   : > { %1020 = vrcp.f32 %v516_v22 }
 0x21b   : > { %v693_v25 = vpop.f32.mrb[12].mxu1  ;;  %813 = vmatprep.subr.bf16.mxu0 %v788_v24 }
 0x21c   : > { %v695_v26 = vpop.f32.mrb[13].mxu1  ;;  %814 = vmatpush1.bf16.msra.mxu0 %v787_v23  ;;  %v760_v30 = vmax.f32 %v693_v25, 0.0 }
 0x21d   : > { %v697_v29 = vpop.f32.mrb[14].mxu1  ;;  %v761_v33 = vmax.f32 %v695_v26, 0.0 }
 0x21e   : > { %v762_v31 = vmax.f32 %v697_v29, 0.0  ;;  %v699_v32 = vpop.f32.mrb[15].mxu1 }
 0x21f   : > { %v763_v34 = vmax.f32 %v699_v32, 0.0 }
 0x220   : > { %v789_v35 = vpack.c.bf16 %v762_v31, %v760_v30 }
 0x221   : > { %v790_v37 = vpack.c.bf16 %v763_v34, %v761_v33 }
 0x223   : > { %v1019_v38 = vpop.eup %1018  ;;  %v703_v39 = vpop.f32.mrb[16].mxu1  ;;  %815 = vmatprep.subr.bf16.mxu0 %v790_v37  ;;  %v784_v37 = vld [vmem:[%s1226_s2] sm:$0x1] }
 0x224   : > { %v1021_v40 = vpop.eup %1020  ;;  %v521_v41 = vsub.f32 1.0, %v1019_v38  ;;  %v705_v42 = vpop.f32.mrb[17].mxu1  ;;  %816 = vmatpush1.bf16.msra.mxu0 %v789_v35  ;;  %v764_v47 = vmax.f32 %v703_v39, 0.0 }
 0x225   : > { %v522_v44 = vsub.f32 1.0, %v1021_v40  ;;  %v707_v45 = vpop.f32.mrb[18].mxu1  ;;  %v765_v54 = vmax.f32 %v705_v42, 0.0 }
 0x226   : > { %v523_v46 = vsel %vm519_vm2, %v1019_v38, %v521_v41  ;;  %v766_v51 = vmax.f32 %v707_v45, 0.0  ;;  %v709_v52 = vpop.f32.mrb[19].mxu1  ;;  %v805_v38 = vpop.permute.xlu0 %804 }
 0x227   : > { %v524_v53 = vsel %vm520_vm3, %v1021_v40, %v522_v44  ;;  %v767_v56 = vmax.f32 %v709_v52, 0.0  ;;  %v810_v39 = vrot.slane %v805_v38, %v464_v50 }
 0x228   : > { %v527_v57 = vcombine.low %v523_v46, %v524_v53  ;;  %v791_v58 = vpack.c.bf16 %v766_v51, %v764_v47 }
 0x229   : > { %v792_v59 = vpack.c.bf16 %v767_v56, %v765_v54 }
 0x22a   : > { %v534_v60 = vrot.slane %v527_v57, %v1191_v43 }
 0x22b   : > { %v713_v55 = vpop.f32.mrb[20].mxu1  ;;  %817 = vmatprep.subr.bf16.mxu0 %v792_v59 }
 0x22c   : > { %v541_v61 = vrot.slane %v534_v60, %v1191_v43  ;;  %v715_v62 = vpop.f32.mrb[21].mxu1  ;;  %818 = vmatpush1.bf16.msra.mxu0 %v791_v58  ;;  %v768_v0 = vmax.f32 %v713_v55, 0.0 }
 0x22d   : > { %v717_v63 = vpop.f32.mrb[22].mxu1  ;;  %v769_v4 = vmax.f32 %v715_v62, 0.0 }
 0x22e   : > { %547 = vst.msk [vmem:[%s1200_s8] sm:$0x3] %vm1203_vm4, %v541_v61  ;;  %v770_v2 = vmax.f32 %v717_v63, 0.0  ;;  %v719_v3 = vpop.f32.mrb[23].mxu1 }
 0x22f   : > { %v771_v5 = vmax.f32 %v719_v3, 0.0 }
 0x230   : > { %v793_v6 = vpack.c.bf16 %v770_v2, %v768_v0 }
 0x231   : > { %v794_v48 = vpack.c.bf16 %v771_v5, %v769_v4 }
 0x233   : > { %v723_v7 = vpop.f32.mrb[24].mxu1  ;;  %819 = vmatprep.subr.bf16.mxu0 %v794_v48 }
 0x234   : > { %v725_v8 = vpop.f32.mrb[25].mxu1  ;;  %820 = vmatpush1.bf16.msra.mxu0 %v793_v6  ;;  %v772_v10 = vmax.f32 %v723_v7, 0.0 }
 0x235   : > { %v727_v9 = vpop.f32.mrb[26].mxu1  ;;  %v773_v13 = vmax.f32 %v725_v8, 0.0 }
 0x236   : > { %v774_v11 = vmax.f32 %v727_v9, 0.0  ;;  %v729_v12 = vpop.f32.mrb[27].mxu1 }
 0x237   : > { %v775_v14 = vmax.f32 %v729_v12, 0.0 }
 0x238   : > { %v795_v15 = vpack.c.bf16 %v774_v11, %v772_v10 }
 0x239   : > { %v796_v16 = vpack.c.bf16 %v775_v14, %v773_v13 }
 0x23b   : > { %v733_v17 = vpop.f32.mrb[28].mxu1  ;;  %821 = vmatprep.subr.bf16.mxu0 %v796_v16 }
 0x23c   : > { %v735_v18 = vpop.f32.mrb[29].mxu1  ;;  %822 = vmatpush1.bf16.msra.mxu0 %v795_v15  ;;  %v776_v20 = vmax.f32 %v733_v17, 0.0 }
 0x23d   : > { %v737_v19 = vpop.f32.mrb[30].mxu1  ;;  %v777_v23 = vmax.f32 %v735_v18, 0.0 }
 0x23e   : > { %v778_v21 = vmax.f32 %v737_v19, 0.0  ;;  %v739_v22 = vpop.f32.mrb[31].mxu1 }
 0x23f   : > { %v779_v24 = vmax.f32 %v739_v22, 0.0 }
 0x240   : > { %v797_v25 = vpack.c.bf16 %v778_v21, %v776_v20 }
 0x241   : > { %v798_v26 = vpack.c.bf16 %v779_v24, %v777_v23 }
 0x243   : > { %v743_v27 = vpop.f32.mrb[32].mxu1  ;;  %823 = vmatprep.subr.bf16.mxu0 %v798_v26 }
 0x244   : > { %v745_v28 = vpop.f32.mrb[33].mxu1  ;;  %824 = vmatpush1.bf16.msra.mxu0 %v797_v25  ;;  %v780_v30 = vmax.f32 %v743_v27, 0.0 }
 0x245   : > { %v747_v29 = vpop.f32.mrb[34].mxu1  ;;  %v781_v33 = vmax.f32 %v745_v28, 0.0 }
 0x246   : > { %v782_v31 = vmax.f32 %v747_v29, 0.0  ;;  %v749_v32 = vpop.f32.mrb[35].mxu1 }
 0x247   : > { %v783_v34 = vmax.f32 %v749_v32, 0.0 }
 0x248   : > { %v799_v35 = vpack.c.bf16 %v782_v31, %v780_v30 }
 0x249   : > { %v800_v36 = vpack.c.bf16 %v783_v34, %v781_v33 }
 0x24b   : > { %825 = vmatprep.subr.bf16.mxu0 %v800_v36 }
 0x24c   : > { %826 = vmatpush1.bf16.msra.mxu0 %v799_v35 }
 0x24f   : > { %844 = vmatmul.mubr.bf16.vlgmr.msra.gmra.mrb[32].mxu0 %v784_v37 }
 0x322   : > { %v845_v40 = vpop.f32.mrb[32].mxu0 }
 0x323   : > { %v846_v41 = vadd.f32 %v845_v40, %v810_v39  ;;  %v847_v42 = vpop.f32.mrb[33].mxu0 }
 0x324   : > { %v848_v44 = vadd.f32 %v847_v42, %v810_v39  ;;  %v849_v45 = vpop.f32.mrb[34].mxu0 }
 0x325   : > { %v852_v46 = vand.u32 2147483647, %v846_v41  ;;  %v850_v47 = vpop.f32.mrb[35].mxu0  ;;  %vm864_vm5 = vcmp.ge.f32.partialorder %v846_v41, 0.0 }
 0x326   : > { %v853_v51 = vand.u32 2147483647, %v848_v44  ;;  %vm865_vm6 = vcmp.ge.f32.partialorder %v848_v44, 0.0 }
 0x327   : > { %v854_v52 = vsub.f32 0.0, %v852_v46 }
 0x328   : > { %v855_v53 = vsub.f32 0.0, %v853_v51 }
 0x329   : > { %v856_v54 = vmul.f32 1.442695, %v854_v52 }
 0x32a   : > { %v858_v56 = vmul.f32 1.442695, %v855_v53 }
 0x32b   : > { %1022 = vpow2.f32 %v856_v54 }
 0x32c   : > { %1024 = vpow2.f32 %v858_v56 }
 0x335   : > { %v1023_v57 = vpop.eup %1022 }
 0x336   : > { %v1025_v58 = vpop.eup %1024  ;;  %v860_v59 = vadd.f32 1.0, %v1023_v57 }
 0x337   : > { %v861_v49 = vadd.f32 1.0, %v1025_v58 }
 0x338   : > { %1026 = vrcp.f32 %v860_v59 }
 0x339   : > { %1028 = vrcp.f32 %v861_v49 }
 0x342   : > { %v1027_v50 = vpop.eup %1026 }
 0x343   : > { %v1029_v60 = vpop.eup %1028  ;;  %v866_v55 = vsub.f32 1.0, %v1027_v50 }
 0x344   : > { %v867_v61 = vsub.f32 1.0, %v1029_v60 }
 0x345   : > { %v868_v62 = vsel %vm864_vm5, %v1027_v50, %v866_v55 }
 0x346   : > { %v869_v63 = vsel %vm865_vm6, %v1029_v60, %v867_v61 }
 0x347   : > { %v872_v0 = vcombine.low %v868_v62, %v869_v63 }
 0x349   : > { %v879_v2 = vrot.slane %v872_v0, %v1191_v43 }
 0x34b   : > { %v886_v3 = vrot.slane %v879_v2, %v1191_v43 }
 0x34d   : > { %984 = vst.msk [vmem:[%s1200_s8 + $0x2] sm:$0x3] %vm1203_vm4, %v886_v3 }
 0x34e PF: > { %s16_s17 = sadd.s32 1, %s1036_s17  }
 0x34f   : > { %p13_p4 = scmp.ge.s32.totalorder %s16_s17, 4  }
 0x351   :  { %15 = sbr.rel (!%p13_p4) target bundleno = 3 (0x3), region = 68 }

</bundles_post_ra>
